<compile_context>
chip_gen: v7x
topology: tpu7x:2x2x1
jax: 0.10.0
libtpu: 0.0.40
codegen_flags: <defaults>
</compile_context>

<pallas_src>
import jax
import jax.numpy as jnp
from jax.experimental import pallas as pl
from jax.experimental.pallas import tpu as pltpu

_LANES = 128
# ~8 MiB blocks: ~2.5 us of DMA per step at v7x's 3.2 TB/s (step overhead <15%),
# ~6 us on v6e, ~10 us on v5e.  Double-buffered 2 x (in + out) x 8 MiB = 32 MiB
# fits every chip's VMEM with headroom.
_TARGET_BLOCK_BYTES = 8 * 1024 * 1024
_VMEM_MARGIN_BYTES = 4 * 1024 * 1024


def _negate_kernel(x_ref, o_ref):
    # VPU elementwise negate (score * -1); purely HBM-bandwidth bound.
    o_ref[...] = jnp.negative(x_ref[...])


def _round_up(x, m):
    return ((x + m - 1) // m) * m


def _round_down(x, m):
    return (x // m) * m


def _negate_2d(slab, *, block_rows=None, donate=False):
    """Negate a 2D slab with a row-tiled, cdiv-gridded pallas_call."""
    rows, cols = slab.shape
    itemsize = jnp.dtype(slab.dtype).itemsize
    # Layout-friendly sublane multiple: f32 -> 8, bf16 -> 16, int8/fp8 -> 32.
    sub = max(8, 32 // itemsize)

    if block_rows is None:
        row_bytes = cols * itemsize
        target_rows = max(sub, _round_down(max(1, _TARGET_BLOCK_BYTES // row_bytes), sub))
        if rows <= sub:
            # Full-extent block (legal for any row count).
            # TODO(synk): a huge ragged 1D input collapses to one block here;
            # typical discriminator score maps never hit that case.
            block_rows = rows
        else:
            # Megacore split: guarantee >= 2 grid steps so both v7x TensorCores
            # get work on the "parallel" axis; neutral on 1-TC v5e/v6e.
            half_rows = _round_up(-(-rows // 2), sub)
            block_rows = max(sub, min(target_rows, half_rows))
    else:
        block_rows = min(block_rows, rows)
        if block_rows < rows:
            block_rows = max(sub, _round_down(block_rows, sub))

    grid = (pl.cdiv(rows, block_rows),)

    # Scoped VMEM request derived from the actual double-buffered footprint.
    block_bytes = block_rows * cols * itemsize
    vmem_limit = min(4 * block_bytes + _VMEM_MARGIN_BYTES, 100 * 1024 * 1024)

    total = rows * cols
    call_kwargs = dict(
        out_shape=jax.ShapeDtypeStruct(slab.shape, slab.dtype),
        grid=grid,
        in_specs=[pl.BlockSpec((block_rows, cols), lambda i: (i, 0))],
        out_specs=pl.BlockSpec((block_rows, cols), lambda i: (i, 0)),
        compiler_params=pltpu.CompilerParams(
            dimension_semantics=("parallel",),
            vmem_limit_bytes=vmem_limit,
        ),
        cost_estimate=pl.CostEstimate(
            flops=total,
            transcendentals=0,
            bytes_accessed=2 * total * itemsize,
        ),
    )
    if donate:
        # Reuse the input HBM buffer for the output (caller should donate).
        call_kwargs["input_output_aliases"] = {0: 0}

    return pl.pallas_call(_negate_kernel, **call_kwargs)(slab)


def wasserstein_loss(score, real, gen, *, block_rows=None, donate=False):
    """Pallas implementation of WassersteinLoss.forward.

    score: jnp array of any shape (e.g. NCHW [B, C, H, W]).
    real, gen: Python bools (compile-time branch, matching the PyTorch module).
    Returns an array with the same shape/dtype/values as the PyTorch module.
    """
    # gen -> *1 ; (not gen) and real -> *1 ; else -> *-1
    if gen or real:
        # Identity branches: skip the kernel entirely (no HBM read/write).
        return score

    orig_shape = score.shape
    total = score.size
    if total == 0:
        return score

    if total % _LANES == 0:
        # Lane-dense [rows, 128] slab: free contiguous reshape, unmasked stores.
        slab = score.reshape(total // _LANES, _LANES)
    else:
        # Ragged total: keep the trailing dim (full-extent last block dim) and
        # tile the collapsed leading dims.  No wrapper-side pad/slice -> one
        # read + one write pass over HBM; the ragged last row-block is masked
        # by Pallas (stores lane-masked only when last_dim % 128 != 0).
        if score.ndim >= 2:
            slab = score.reshape(-1, orig_shape[-1])
        else:
            slab = score.reshape(1, total)

    out = _negate_2d(slab, block_rows=block_rows, donate=donate)
    return out.reshape(orig_shape)


if __name__ == "__main__":
    key = jax.random.PRNGKey(0)
    k0, k1, k2 = jax.random.split(key, 3)

    # Discriminator score map, NCHW-like small shape (128-aligned total).
    score = jax.random.normal(k0, (2, 4, 16, 16), dtype=jnp.float32)

    # Case 1: generator training -> score * 1 (identity, no kernel launch)
    out_gen = wasserstein_loss(score, real=False, gen=True)
    # Case 2: discriminator, real -> score * 1 (identity, no kernel launch)
    out_real = wasserstein_loss(score, real=True, gen=False)
    # Case 3: discriminator, fake -> score * -1 (Pallas negate kernel,
    # auto-split into >= 2 grid steps for megacore).
    out_fake = wasserstein_loss(score, real=False, gen=False)
    # Forced small blocks (exercises cdiv grid / multiple steps explicitly).
    out_fake_tiled = wasserstein_loss(score, real=False, gen=False, block_rows=8)

    # Ragged total (not a multiple of 128): pad-free masked path.
    score_ragged = jax.random.normal(k1, (3, 5, 7), dtype=jnp.float32)
    out_ragged = wasserstein_loss(score_ragged, real=False, gen=False)

    # bf16 path (sublane multiple 16, full-extent block).
    score_bf16 = jax.random.normal(k2, (2, 4, 16, 16), dtype=jnp.bfloat16)
    out_bf16 = wasserstein_loss(score_bf16, real=False, gen=False)

    # Donation / buffer-aliasing path (expected value computed beforehand).
    score_d = score + 1.0
    expected_d = -(score + 1.0)
    out_d = wasserstein_loss(score_d, real=False, gen=False, donate=True)

    jax.block_until_ready((out_gen, out_real, out_fake, out_fake_tiled,
                           out_ragged, out_bf16, out_d, expected_d))

    assert out_gen.shape == score.shape and out_gen.dtype == score.dtype
    assert out_fake.shape == score.shape and out_fake.dtype == score.dtype
    assert jnp.allclose(out_gen, score)
    assert jnp.allclose(out_real, score)
    assert jnp.allclose(out_fake, -score)
    assert jnp.allclose(out_fake_tiled, -score)
    assert out_ragged.shape == score_ragged.shape
    assert jnp.allclose(out_ragged, -score_ragged)
    assert out_bf16.dtype == jnp.bfloat16
    assert jnp.allclose(out_bf16.astype(jnp.float32), -score_bf16.astype(jnp.float32))
    assert jnp.allclose(out_d, expected_d)

    print("KERNEL_OK")
</pallas_src>

<mosaic_0001>
module attributes {stable_mosaic.version = 11 : i64} {
  func.func @_negate_kernel(%arg0: i32, %arg1: memref<8x128xf32, #tpu.memory_space<vmem>>, %arg2: memref<8x128xf32, #tpu.memory_space<vmem>>) attributes {dimension_semantics = [#tpu.dimension_semantics<parallel>], iteration_bounds = array<i64: 2>, scalar_prefetch = 0 : i64, scratch_operands = 0 : i64, tpu.core_type = #tpu.core_type<tc>, window_params = [{transform_indices = @transform_0, window_bounds = array<i64: 8, 128>}, {transform_indices = @transform_1, window_bounds = array<i64: 8, 128>}]} {
    %c0 = arith.constant 0 : index
    %c0_0 = arith.constant 0 : index
    %0 = vector.load %arg1[%c0, %c0_0] : memref<8x128xf32, #tpu.memory_space<vmem>>, vector<8x128xf32>
    %cst = arith.constant 0.000000e+00 : f32
    %1 = vector.broadcast %cst : f32 to vector<8x128xf32>
    %2 = arith.subf %1, %0 : vector<8x128xf32>
    %c0_1 = arith.constant 0 : index
    %c0_2 = arith.constant 0 : index
    %3 = vector.load %arg2[%c0_1, %c0_2] : memref<8x128xf32, #tpu.memory_space<vmem>>, vector<8x128xf32>
    tpu.vector_store %arg2[%c0_1, %c0_2], %2 {strides = array<i32>} : memref<8x128xf32, #tpu.memory_space<vmem>>, vector<8x128xf32>,
    return
  }
  func.func @transform_0(%arg0: i32) -> (i32, i32) {
    %c0_i32 = arith.constant 0 : i32
    %c0_i32_0 = arith.constant 0 : i32
    return %arg0, %c0_i32 : i32, i32
  }
  func.func @transform_1(%arg0: i32) -> (i32, i32) {
    %c0_i32 = arith.constant 0 : i32
    %c0_i32_0 = arith.constant 0 : i32
    return %arg0, %c0_i32 : i32, i32
  }
}

</mosaic_0001>

<bundles_post_ra>
// kernel: tpu_custom_call.1
= control target key start
LH: loop header
LB: loop body
LE: loop exit
PB: predicated region body
PF: predicated region fallthrough
CT: control target
= control target key end

     0   :  { %6 = vsyncpa [#allocation3], 0  ;;  %s548_s0 = inlined_call_operand.hbm [shape: f32[16,128], index: 0, kind: input, shape index: {}]   ;;  %s549_s1 = inlined_call_operand.hbm [shape: f32[16,128], index: 1, kind: output, shape index: {}]  }
   0x1   :  { %8 = vsyncpa [#allocation3 + $0x1], 0 }
   0x2   :  { %9 = vsyncpa [#allocation4], 0 }
   0x3   :  { %11 = vsyncpa [#allocation4 + $0x1], 0  ;;  %s387_s6 = smov 0   ;;  %s389_s7 = smov 0  }
   0x4   :  { %s391_s8 = smov 0   ;;  %s393_s9 = smov 0  }
   0x5 LB: > { %s408_s10 = sadd.s32 4294967295, %s373_s9   ;;  %s219_s11 = sadd.s32 4294967294, %s373_s9   ;;  %s373_s9 = sphi %s393_s9, %s564_s9   ;;  %s369_s8 = sphi %s391_s8, %s563_s8   ;;  %s365_s7 = sphi %s389_s7, %s562_s7   ;;  %s361_s6 = sphi %s387_s6, %s561_s6  }
   0x6   : > { %s412_s12 = sadd.s32 1, %s373_s9   ;;  %s24_s13 = sadd.s32 1, %s369_s8 }
   0x7   : > { %s21_s14 = ssub.s32 %s373_s9, %s412_s12  ;;  %p31_p0 = scmp.ne.s32.totalorder %s369_s8, %s365_s7 }
   0x8   : > { %p22_p1 = scmp.eq.s32.totalorder %s21_s14, 0  ;;  %p32_p2 = scmp.eq.s32.totalorder %s373_s9, 0 }
   0x9   : > { %p37_p3 = scmp.ne.s32.totalorder %s365_s7, %s361_s6  ;;  %p38_p4 = scmp.eq.s32.totalorder %s408_s10, 0 }
   0xa   : > { %s424_s15 = scalar_select %p22_p1, %s369_s8, %s24_s13  }
   0xb   : > { %p426_p5 = por %p32_p2, %p31_p0  ;;  %p430_p6 = por %p38_p4, %p37_p3 }
   0xc   : > { %p61_p7 = scmp.eq.s32.totalorder %s408_s10, 1  ;;  %p67_p8 = scmp.eq.s32.totalorder %s219_s11, 1 }
   0xd   : > { %p243_p10 = scmp.lt.s32.totalorder %s373_s9, 2  ;;  %s87_s20 = sand.u32 1, %s369_s8  }
   0xe   : > { %p437_p11 = por %p61_p7, %p31_p0  ;;  %p441_p12 = por %p67_p8, %p37_p3 }
   0xf   : > { %s223_s21 = sshll.u32 %s373_s9, 7  ;;  %s222_s22 = sshll.u32 %s87_s20, 3 }
  0x10   : > { %s553_s18 = scalar_select %p437_p11, 1, 0 }
  0x11   : > { %s554_s19 = scalar_select %p441_p12, 1, 0 }
  0x12   : > { %s450_s25 = scalar_lea.hbm %s548_s0, %s223_s21  ;;  %s91_s26 = scalar_lea.vmem [#allocation2], %s222_s22 }
  0x13   : > { %s98_s27 = sshll.u32 %s91_s26, 4  ;;  %p454_p13 = pnand %p243_p10, %p426_p5  ;;  %s458_s27 = int_to_ptr.vmem [resolvable:$true] %s98_s27 }
  0x14   : > { %s88_s29 = scalar_lea.sflag [#allocation3], %s87_s20  ;;  %s277_s30 = scalar_lea.hbm %s450_s25, 128 }
  0x15   : > { %p278_p2 = scmp.ne.s32.totalorder %s450_s25, %s277_s30  ;;  %p279_p3 = pneg %p454_p13 }
  0x16   : > { %s282_s4 = scalar_lea.hbm %s548_s0, 256  ;;  %p283_p5 = scmp.lt.u32.totalorder %s450_s25, %s548_s0 }
  0x17   : > { %p280_p4 = pnand %p279_p3, %p278_p2  ;;  %p284_p8 = scmp.lt.u32.totalorder %s282_s4, %s277_s30 }
  0x18   : > { %p286_p9 = scmp.lt.u32.totalorder %s277_s30, %s450_s25 }
  0x19   : > { %p281_p7 = pneg %p280_p4  ;;  %p285_p10 = por %p284_p8, %p283_p5 }
  0x1b   : > { %p287_p0 = por %p286_p9, %p285_p10 }
  0x1d   : > { %p288_p1 = pnand %p287_p0, %p281_p7 }
  0x1f   : > { %291 = shalt.err (!%p288_p1)
}
  0x20   : > { %s292_s13 = scalar_lea.vmem %s458_s27, 128  ;;  %s375_s14 = smov [#allocation2]  }
  0x21   : > { %p293_p2 = scmp.ne.s32.totalorder %s458_s27, %s292_s13  ;;  %s297_s16 = sshll.u32 %s375_s14, 4  ;;  %s298_s16 = int_to_ptr.vmem [resolvable:$false] %s297_s16 }
  0x22   : > { %s299_s20 = scalar_lea.vmem %s298_s16, 256  ;;  %p300_p11 = scmp.lt.s32.totalorder %s458_s27, %s298_s16 }
  0x23   : > { %p295_p4 = pnand %p293_p2, %p279_p3  ;;  %p301_p5 = scmp.lt.s32.totalorder %s299_s20, %s292_s13 }
  0x25   : > { %p296_p12 = pneg %p295_p4  ;;  %p302_p8 = por %p301_p5, %p300_p11 }
  0x27   : > { %p303_p9 = pnand %p302_p8, %p296_p12 }
  0x29   : > { %306 = shalt.err (!%p303_p9)
}
  0x2a   : > { %238 = dma.hbm_to_vmem [thread:$0]  (!%p454_p13), %s450_s25, 128, %s458_s27, %s88_s29  }
  0x2b   : > { %p556_p0 = scmp.lt.s32.totalorder %s373_s9, 3  ;;  %p557_p1 = scmp.ge.s32.totalorder %s373_s9, 1 }
  0x2d   : > { %p104_p3 = pnand %p557_p1, %p556_p0 }
  0x2e   : > { %s492_s21 = sand.u32 (!%p104_p3), 1, %s365_s7  }
  0x2f   : > { %107 = sbr.rel (%p104_p3) target bundleno = 81 (0x51), region = 24  ;;  %s225_s22 = sshll.u32 (!%p104_p3), %s492_s21, 3 }
  0x30   : > { %s110_s23 = scalar_lea.sflag (!%p104_p3), [#allocation3], %s492_s21  ;;  %s113_s24 = scalar_lea.vmem (!%p104_p3), [#allocation2], %s225_s22 }
  0x36   : > { %352 = dma.done.wait (%p430_p6), %s110_s23, 128  }
  0x37   : > { %354 = vsyncadd (%p430_p6), %s110_s23, 4294967168  ;;  %s131_s25 = scalar_lea.vmem [#allocation5], %s225_s22  ;;  %s228_s27 = sshll.u32 %s408_s10, 7  ;;  %v132_v0 = vld [vmem:[%s113_s24] sm:$0xff] }
  0x38   : > { %s149_s26 = sshll.u32 %s131_s25, 4  ;;  %v133_v1 = vsub.f32 0.0, %v132_v0  ;;  %s506_s30 = scalar_lea.hbm %s549_s1, %s228_s27  ;;  %s501_s26 = int_to_ptr.vmem [resolvable:$true] %s149_s26 }
  0x39   : > { %s136_s17 = scalar_lea.sflag [#allocation4], %s492_s21  ;;  %s307_s2 = scalar_lea.vmem %s501_s26, 128 }
  0x3a   : > { %134 = vst [vmem:[%s131_s25] sm:$0xff] %v133_v1  ;;  %p308_p6 = scmp.ne.s32.totalorder %s501_s26, %s307_s2  ;;  %p558_p11 = scmp.ne.s32.totalorder %s553_s18, 0 }
  0x3b   : > { %s376_s10 = smov [#allocation5]  }
  0x3c   : > { %p309_p12 = pnand %p308_p6, %p558_p11  ;;  %s311_s3 = sshll.u32 %s376_s10, 4  ;;  %s312_s3 = int_to_ptr.vmem [resolvable:$false] %s311_s3 }
  0x3d   : > { %s313_s4 = scalar_lea.vmem %s312_s3, 256  ;;  %p314_p7 = scmp.lt.s32.totalorder %s501_s26, %s312_s3 }
  0x3e   : > { %p310_p13 = pneg %p309_p12  ;;  %p315_p10 = scmp.lt.s32.totalorder %s313_s4, %s307_s2 }
  0x40   : > { %p316_p2 = por %p315_p10, %p314_p7 }
  0x42   : > { %p317_p4 = pnand %p316_p2, %p310_p13 }
  0x44   : > { %320 = shalt.err (!%p317_p4)
}
  0x45   : > { %s321_s5 = scalar_lea.hbm %s506_s30, 128  ;;  %s325_s14 = scalar_lea.hbm %s549_s1, 256 }
  0x46   : > { %p322_p5 = scmp.ne.s32.totalorder %s506_s30, %s321_s5  ;;  %p326_p0 = scmp.lt.u32.totalorder %s506_s30, %s549_s1 }
  0x47   : > { %p327_p1 = scmp.lt.u32.totalorder %s325_s14, %s321_s5  ;;  %p329_p6 = scmp.lt.u32.totalorder %s321_s5, %s506_s30 }
  0x48   : > { %p323_p8 = pnand %p322_p5, %p558_p11 }
  0x49   : > { %p328_p3 = por %p327_p1, %p326_p0 }
  0x4a   : > { %p324_p9 = pneg %p323_p8 }
  0x4b   : > { %p330_p12 = por %p329_p6, %p328_p3 }
  0x4d   : > { %p331_p13 = pnand %p330_p12, %p324_p9 }
  0x4f   : > { %334 = shalt.err (!%p331_p13)
}
  0x50   : > { %233 = dma.vmem_to_hbm [thread:$0]  (%p558_p11), %s501_s26, 128, %s506_s30, %s136_s17  }
  0x51 PF: > { %s161_s21 = sand.u32 1, %s361_s6   ;;  %p559_p7 = scmp.ne.s32.totalorder %s554_s19, 0 }
  0x52   : > { %p560_p10 = scmp.ge.s32.totalorder %s373_s9, 2  ;;  %s162_s22 = scalar_lea.sflag [#allocation4], %s161_s21 }
  0x54   : > { %p240_p2 = pnand %p560_p10, %p559_p7 }
  0x56   : > { %356 = dma.done.wait (!%p240_p2), %s162_s22, 128  }
  0x57   : > { %358 = vsyncadd (!%p240_p2), %s162_s22, 4294967168  ;;  %p14_p4 = scmp.ge.s32.totalorder %s412_s12, 4   ;;  %s561_s6 = smov %s365_s7 }
  0x58   : > { %s562_s7 = smov %s369_s8  ;;  %s563_s8 = smov %s424_s15 }
  0x59   : > { %s564_s9 = smov %s412_s12  ;;  %16 = sbr.rel (!%p14_p4) target bundleno = 5 (0x5), region = 69 }
  0x60   :  { %167 = vsyncpa [#allocation3], 1 }
  0x61   :  { %169 = vsyncpa [#allocation3 + $0x1], 1 }
  0x62   :  { %170 = vsyncpa [#allocation4], 1 }
  0x63   :  { %172 = vsyncpa [#allocation4 + $0x1], 1 }

</bundles_post_ra>
